<compile_context>
chip_gen: v7x
topology: tpu7x:2x2x1
jax: 0.10.0
libtpu: 0.0.40
codegen_flags: <defaults>
</compile_context>

<pallas_src>
import jax
import jax.numpy as jnp
from jax.experimental import pallas as pl
from jax.experimental.pallas import tpu as pltpu


def _round_up(x, m):
    return ((x + m - 1) // m) * m


def _linear_relu_kernel(x_ref, w_ref, b_ref, o_ref):
    # x_ref: (tm, F), w_ref: (F, N), b_ref: (1, N) f32, o_ref: (tm, N)
    y = jnp.dot(x_ref[...], w_ref[...], preferred_element_type=jnp.float32)
    y = y + b_ref[...]                       # broadcast (1, N) over rows, f32
    o_ref[...] = jnp.maximum(y, 0.0).astype(o_ref.dtype)


def _choose_tm(batch):
    """Row-tile heuristic.

    B <= 256: one grid step (don't duplicate the resident-W DMA across v7x cores
    for tiny batches).  Larger B: biggest tile <= 512 rows that still yields >= 3-4
    grid steps, so each v7x TensorCore gets >= 2 pipelined steps of work.
    """
    b8 = _round_up(batch, 8)                  # sublane alignment
    if b8 <= 256:
        return b8
    tm = _round_up(pl.cdiv(b8, 4), 8)
    return int(max(128, min(512, tm)))


def feature_extractor(x, w, b, *, tm=None):
    """relu(x @ w + b) as a single Pallas TPU kernel.

    x: (B, F) activations (f32 or bf16)
    w: (F, N) weight (transposed PyTorch Linear weight; same dtype family as x)
    b: (N,)   bias (added in f32)
    Output dtype follows x.dtype (bf16 in -> bf16 out, halving writeback bytes).
    """
    B, F = x.shape
    F2, N = w.shape
    assert F == F2, "weight inner dim must match feature size"
    out_dtype = x.dtype

    if tm is None:
        tm = _choose_tm(B)
    tm = max(8, _round_up(tm, 8))
    grid = (pl.cdiv(B, tm),)                  # partial last block handled by masking

    b2 = b.reshape(1, N).astype(jnp.float32)  # tiny; keeps bias add exact in f32

    x_bytes = x.dtype.itemsize
    w_bytes = w.dtype.itemsize
    out_bytes = jnp.dtype(out_dtype).itemsize

    # VMEM budget: double-buffered x/out tiles + (conservatively) double-buffered
    # resident weight + bias.  Cap well below v7x's 64 MiB physical VMEM.
    step_bytes = (2 * tm * F * x_bytes
                  + 2 * tm * N * out_bytes
                  + 2 * F * N * w_bytes
                  + 2 * N * 4)
    vmem_limit = int(min(48 * 1024 * 1024, max(16 * 1024 * 1024, 2 * step_bytes)))

    cost = pl.CostEstimate(
        flops=2 * B * F * N,
        transcendentals=0,
        bytes_accessed=(B * F * x_bytes + F * N * w_bytes + N * 4
                        + B * N * out_bytes),
    )

    return pl.pallas_call(
        _linear_relu_kernel,
        out_shape=jax.ShapeDtypeStruct((B, N), out_dtype),
        grid_spec=pltpu.PrefetchScalarGridSpec(
            num_scalar_prefetch=0,
            grid=grid,
            in_specs=[
                pl.BlockSpec((tm, F), lambda i: (i, 0)),   # row tile of x
                pl.BlockSpec((F, N), lambda i: (0, 0)),    # full weight, resident
                pl.BlockSpec((1, N), lambda i: (0, 0)),    # bias (f32)
            ],
            out_specs=pl.BlockSpec((tm, N), lambda i: (i, 0)),
        ),
        compiler_params=pltpu.CompilerParams(
            dimension_semantics=("parallel",),
            vmem_limit_bytes=vmem_limit,
        ),
        cost_estimate=cost,
    )(x, w, b2)


def feature_extractor_ref(x, w, b):
    return jnp.maximum(x @ w + b, 0.0)


if __name__ == "__main__":
    # Module defaults: features_size=1024, num_features=64.
    features_size = 1024
    num_features = 64

    key = jax.random.PRNGKey(0)
    kx, kw, kb, kx2, kx3 = jax.random.split(key, 5)

    bound = 1.0 / (features_size ** 0.5)
    w = jax.random.uniform(kw, (features_size, num_features),
                           minval=-bound, maxval=bound, dtype=jnp.float32)
    b = jax.random.uniform(kb, (num_features,),
                           minval=-bound, maxval=bound, dtype=jnp.float32)

    # Case 1: tiny batch, single grid step, exact f32 path.
    x = jax.random.normal(kx, (8, features_size), dtype=jnp.float32)
    out = jax.block_until_ready(feature_extractor(x, w, b))
    ref = feature_extractor_ref(x, w, b)
    assert out.shape == (8, num_features) and out.dtype == jnp.float32
    assert jnp.allclose(out, ref, atol=1e-5, rtol=1e-5)

    # Case 2: ragged batch -> masked partial block, no row padding in the wrapper.
    x2 = jax.random.normal(kx2, (10, features_size), dtype=jnp.float32)
    out2 = jax.block_until_ready(feature_extractor(x2, w, b))
    ref2 = feature_extractor_ref(x2, w, b)
    assert out2.shape == (10, num_features)
    assert jnp.allclose(out2, ref2, atol=1e-5, rtol=1e-5)

    # Case 3: multi-step grid (tm heuristic, ragged last block) + bf16 fast path
    # (inputs already bf16 upstream -> bf16 output, f32 accumulation).
    x3 = jax.random.normal(kx3, (300, features_size), dtype=jnp.float32)
    out3 = jax.block_until_ready(feature_extractor(x3, w, b))
    ref3 = feature_extractor_ref(x3, w, b)
    assert out3.shape == (300, num_features)
    assert jnp.allclose(out3, ref3, atol=1e-5, rtol=1e-5)

    out3_bf16 = jax.block_until_ready(
        feature_extractor(x3.astype(jnp.bfloat16), w.astype(jnp.bfloat16), b))
    assert out3_bf16.dtype == jnp.bfloat16
    assert jnp.allclose(out3_bf16.astype(jnp.float32), ref3, atol=5e-2, rtol=5e-2)

    print("KERNEL_OK")
</pallas_src>

<mosaic_0001>
module attributes {stable_mosaic.version = 11 : i64} {
  func.func @_linear_relu_kernel(%arg0: i32, %arg1: memref<8x1024xf32, #tpu.memory_space<vmem>>, %arg2: memref<1024x64xf32, #tpu.memory_space<vmem>>, %arg3: memref<1x64xf32, #tpu.memory_space<vmem>>, %arg4: memref<8x64xf32, #tpu.memory_space<vmem>>) attributes {dimension_semantics = [#tpu.dimension_semantics<parallel>], iteration_bounds = array<i64: 1>, scalar_prefetch = 0 : i64, scratch_operands = 0 : i64, tpu.core_type = #tpu.core_type<tc>, window_params = [{transform_indices = @transform_0, window_bounds = array<i64: 8, 1024>}, {pipeline_mode = #tpu.pipeline_mode<synchronous>, transform_indices = @transform_1, window_bounds = array<i64: 1024, 64>}, {pipeline_mode = #tpu.pipeline_mode<synchronous>, transform_indices = @transform_2, window_bounds = array<i64: 1, 64>}, {transform_indices = @transform_3, window_bounds = array<i64: 8, 64>}]} {
    %c0 = arith.constant 0 : index
    %c0_0 = arith.constant 0 : index
    %0 = vector.load %arg1[%c0, %c0_0] : memref<8x1024xf32, #tpu.memory_space<vmem>>, vector<8x1024xf32>
    %c0_1 = arith.constant 0 : index
    %c0_2 = arith.constant 0 : index
    %1 = vector.load %arg2[%c0_1, %c0_2] : memref<1024x64xf32, #tpu.memory_space<vmem>>, vector<1024x64xf32>
    %cst = arith.constant dense<0.000000e+00> : vector<8x64xf32>
    %2 = tpu.matmul %0, %1, %cst {dimension_numbers = #tpu.dot_dimension_numbers<[1], [0], [0], [1], [0, 0, 1, 1], [], []>} : vector<8x1024xf32>, vector<1024x64xf32>, vector<8x64xf32> -> vector<8x64xf32>
    %c0_3 = arith.constant 0 : index
    %c0_4 = arith.constant 0 : index
    %3 = vector.load %arg3[%c0_3, %c0_4] : memref<1x64xf32, #tpu.memory_space<vmem>>, vector<1x64xf32>
    %4 = vector.broadcast %3 : vector<1x64xf32> to vector<8x64xf32>
    %5 = arith.addf %2, %4 : vector<8x64xf32>
    %cst_5 = arith.constant 0.000000e+00 : f32
    %6 = vector.broadcast %cst_5 : f32 to vector<8x64xf32>
    %7 = arith.maximumf %5, %6 : vector<8x64xf32>
    %c0_6 = arith.constant 0 : index
    %c0_7 = arith.constant 0 : index
    %8 = vector.load %arg4[%c0_6, %c0_7] : memref<8x64xf32, #tpu.memory_space<vmem>>, vector<8x64xf32>
    tpu.vector_store %arg4[%c0_6, %c0_7], %7 {strides = array<i32>} : memref<8x64xf32, #tpu.memory_space<vmem>>, vector<8x64xf32>,
    return
  }
  func.func @transform_0(%arg0: i32) -> (i32, i32) {
    %c0_i32 = arith.constant 0 : i32
    %c0_i32_0 = arith.constant 0 : i32
    return %arg0, %c0_i32 : i32, i32
  }
  func.func @transform_1(%arg0: i32) -> (i32, i32) {
    %c0_i32 = arith.constant 0 : i32
    %c0_i32_0 = arith.constant 0 : i32
    %c0_i32_1 = arith.constant 0 : i32
    return %c0_i32, %c0_i32_0 : i32, i32
  }
  func.func @transform_2(%arg0: i32) -> (i32, i32) {
    %c0_i32 = arith.constant 0 : i32
    %c0_i32_0 = arith.constant 0 : i32
    %c0_i32_1 = arith.constant 0 : i32
    return %c0_i32, %c0_i32_0 : i32, i32
  }
  func.func @transform_3(%arg0: i32) -> (i32, i32) {
    %c0_i32 = arith.constant 0 : i32
    %c0_i32_0 = arith.constant 0 : i32
    return %arg0, %c0_i32 : i32, i32
  }
}

</mosaic_0001>

<bundles_post_ra>
// kernel: tpu_custom_call.1
= control target key start
LH: loop header
LB: loop body
LE: loop exit
PB: predicated region body
PF: predicated region fallthrough
CT: control target
= control target key end

     0   :  { %s1193_s0 = inlined_call_operand.vmem [shape: f32[8,1024], index: 0, kind: input, shape index: {}]   ;;  %s1194_s1 = inlined_call_operand.vmem [shape: f32[1024,64], index: 1, kind: input, shape index: {}]   ;;  %s1195_s2 = inlined_call_operand.vmem [shape: f32[1,64], index: 2, kind: input, shape index: {}]   ;;  %s1196_s3 = inlined_call_operand.hbm [shape: f32[8,64], index: 3, kind: output, shape index: {}]  }
   0x1   :  { %v39_v0 = vld [vmem:[%s1194_s1 + $0x80] sm:$0xff]  ;;  %v40_v1 = vld [vmem:[%s1194_s1 + $0x88] sm:$0xff]  ;;  %v41_v11 = vld [vmem:[%s1194_s1 + $0x90] sm:$0xff] }
   0x2   :  { %v23_v2 = vld [vmem:[%s1194_s1] sm:$0xff]  ;;  %v596_v3 = vpack.c.bf16 %v40_v1, %v39_v0  ;;  %v24_v4 = vld [vmem:[%s1194_s1 + $0x8] sm:$0xff]  ;;  %v42_v13 = vld [vmem:[%s1194_s1 + $0x98] sm:$0xff] }
   0x3   :  { %v71_v5 = vld [vmem:[%s1194_s1 + $0x180] sm:$0xff]  ;;  %v72_v6 = vld [vmem:[%s1194_s1 + $0x188] sm:$0xff]  ;;  %v598_v7 = vpack.c.bf16 %v24_v4, %v23_v2  ;;  %v25_v14 = vld [vmem:[%s1194_s1 + $0x10] sm:$0xff]  ;;  %v600_v16 = vpack.c.bf16 %v42_v13, %v41_v11 }
   0x4   :  { %v628_v8 = vpack.c.bf16 %v72_v6, %v71_v5  ;;  %v55_v9 = vld [vmem:[%s1194_s1 + $0x100] sm:$0xff]  ;;  %v56_v10 = vld [vmem:[%s1194_s1 + $0x108] sm:$0xff]  ;;  %597 = vmatprep.subr.bf16.mxu0 %v596_v3  ;;  %v26_v15 = vld [vmem:[%s1194_s1 + $0x18] sm:$0xff] }
   0x5   :  { %v630_v12 = vpack.c.bf16 %v56_v10, %v55_v9  ;;  %599 = vmatpush3.bf16.msra.mxu0 %v598_v7  ;;  %v602_v17 = vpack.c.bf16 %v26_v15, %v25_v14  ;;  %v73_v18 = vld [vmem:[%s1194_s1 + $0x190] sm:$0xff]  ;;  %v74_v19 = vld [vmem:[%s1194_s1 + $0x198] sm:$0xff]  ;;  %v43_v23 = vld [vmem:[%s1194_s1 + $0xa0] sm:$0xff] }
   0x6   :  { %629 = vmatprep.subr.bf16.mxu1 %v628_v8  ;;  %v57_v20 = vld [vmem:[%s1194_s1 + $0x110] sm:$0xff]  ;;  %v632_v21 = vpack.c.bf16 %v74_v19, %v73_v18  ;;  %v58_v22 = vld [vmem:[%s1194_s1 + $0x118] sm:$0xff]  ;;  %v44_v24 = vld [vmem:[%s1194_s1 + $0xa8] sm:$0xff]  ;;  %601 = vmatprep.subr.bf16.mxu0 %v600_v16 }
   0x7   :  { %631 = vmatpush3.bf16.msra.mxu1 %v630_v12  ;;  %v634_v25 = vpack.c.bf16 %v58_v22, %v57_v20  ;;  %v604_v26 = vpack.c.bf16 %v44_v24, %v43_v23  ;;  %v27_v27 = vld [vmem:[%s1194_s1 + $0x20] sm:$0xff]  ;;  %v28_v28 = vld [vmem:[%s1194_s1 + $0x28] sm:$0xff]  ;;  %v45_v35 = vld [vmem:[%s1194_s1 + $0xb0] sm:$0xff] }
   0x8   :  { %v75_v29 = vld [vmem:[%s1194_s1 + $0x1a0] sm:$0xff]  ;;  %633 = vmatprep.subr.bf16.mxu1 %v632_v21  ;;  %v76_v30 = vld [vmem:[%s1194_s1 + $0x1a8] sm:$0xff]  ;;  %v606_v33 = vpack.c.bf16 %v28_v28, %v27_v27  ;;  %v46_v36 = vld [vmem:[%s1194_s1 + $0xb8] sm:$0xff] }
   0x9   :  { %v59_v31 = vld [vmem:[%s1194_s1 + $0x120] sm:$0xff]  ;;  %v60_v32 = vld [vmem:[%s1194_s1 + $0x128] sm:$0xff]  ;;  %603 = vmatpush3.bf16.msra.mxu0 %v602_v17  ;;  %v636_v34 = vpack.c.bf16 %v76_v30, %v75_v29  ;;  %v29_v37 = vld [vmem:[%s1194_s1 + $0x30] sm:$0xff]  ;;  %v608_v39 = vpack.c.bf16 %v46_v36, %v45_v35 }
   0xa   :  { %605 = vmatprep.subr.bf16.mxu0 %v604_v26  ;;  %v638_v38 = vpack.c.bf16 %v60_v32, %v59_v31  ;;  %v30_v40 = vld [vmem:[%s1194_s1 + $0x38] sm:$0xff]  ;;  %v77_v41 = vld [vmem:[%s1194_s1 + $0x1b0] sm:$0xff]  ;;  %v47_v46 = vld [vmem:[%s1194_s1 + $0xc0] sm:$0xff] }
   0xb   :  { %635 = vmatpush3.bf16.msra.mxu1 %v634_v25  ;;  %v78_v42 = vld [vmem:[%s1194_s1 + $0x1b8] sm:$0xff]  ;;  %v61_v44 = vld [vmem:[%s1194_s1 + $0x130] sm:$0xff]  ;;  %v48_v47 = vld [vmem:[%s1194_s1 + $0xc8] sm:$0xff]  ;;  %v610_v48 = vpack.c.bf16 %v30_v40, %v29_v37 }
   0xc   :  { %637 = vmatprep.subr.bf16.mxu1 %v636_v34  ;;  %v640_v43 = vpack.c.bf16 %v78_v42, %v77_v41  ;;  %v62_v45 = vld [vmem:[%s1194_s1 + $0x138] sm:$0xff]  ;;  %v79_v49 = vld [vmem:[%s1194_s1 + $0x1c0] sm:$0xff]  ;;  %v80_v50 = vld [vmem:[%s1194_s1 + $0x1c8] sm:$0xff]  ;;  %v612_v52 = vpack.c.bf16 %v48_v47, %v47_v46 }
   0xd   :  { %607 = vmatpush3.bf16.msra.mxu0 %v606_v33  ;;  %v642_v51 = vpack.c.bf16 %v62_v45, %v61_v44  ;;  %v31_v53 = vld [vmem:[%s1194_s1 + $0x40] sm:$0xff]  ;;  %v32_v54 = vld [vmem:[%s1194_s1 + $0x48] sm:$0xff]  ;;  %v644_v56 = vpack.c.bf16 %v80_v50, %v79_v49  ;;  %v49_v58 = vld [vmem:[%s1194_s1 + $0xd0] sm:$0xff] }
   0xe   :  { %609 = vmatprep.subr.bf16.mxu0 %v608_v39  ;;  %v63_v55 = vld [vmem:[%s1194_s1 + $0x140] sm:$0xff]  ;;  %v64_v57 = vld [vmem:[%s1194_s1 + $0x148] sm:$0xff]  ;;  %v50_v59 = vld [vmem:[%s1194_s1 + $0xd8] sm:$0xff]  ;;  %v614_v62 = vpack.c.bf16 %v32_v54, %v31_v53 }
   0xf   :  { %639 = vmatpush3.bf16.msra.mxu1 %v638_v38  ;;  %v81_v60 = vld [vmem:[%s1194_s1 + $0x1d0] sm:$0xff]  ;;  %v82_v61 = vld [vmem:[%s1194_s1 + $0x1d8] sm:$0xff]  ;;  %v646_v63 = vpack.c.bf16 %v64_v57, %v63_v55  ;;  %v616_v0 = vpack.c.bf16 %v50_v59, %v49_v58  ;;  %v51_v6 = vld [vmem:[%s1194_s1 + $0xe0] sm:$0xff] }
  0x10   :  { %641 = vmatprep.subr.bf16.mxu1 %v640_v43  ;;  %v33_v1 = vld [vmem:[%s1194_s1 + $0x50] sm:$0xff]  ;;  %v34_v2 = vld [vmem:[%s1194_s1 + $0x58] sm:$0xff]  ;;  %v648_v4 = vpack.c.bf16 %v82_v61, %v81_v60  ;;  %v52_v7 = vld [vmem:[%s1194_s1 + $0xe8] sm:$0xff] }
  0x11   :  { %611 = vmatpush3.bf16.msra.mxu0 %v610_v48  ;;  %v65_v3 = vld [vmem:[%s1194_s1 + $0x150] sm:$0xff]  ;;  %v66_v5 = vld [vmem:[%s1194_s1 + $0x158] sm:$0xff]  ;;  %v83_v8 = vld [vmem:[%s1194_s1 + $0x1e0] sm:$0xff]  ;;  %v618_v10 = vpack.c.bf16 %v34_v2, %v33_v1  ;;  %v620_v14 = vpack.c.bf16 %v52_v7, %v51_v6 }
  0x12   :  { %613 = vmatprep.subr.bf16.mxu0 %v612_v52  ;;  %v84_v9 = vld [vmem:[%s1194_s1 + $0x1e8] sm:$0xff]  ;;  %v35_v11 = vld [vmem:[%s1194_s1 + $0x60] sm:$0xff]  ;;  %v650_v13 = vpack.c.bf16 %v66_v5, %v65_v3  ;;  %v53_v19 = vld [vmem:[%s1194_s1 + $0xf0] sm:$0xff] }
  0x13   :  { %643 = vmatpush3.bf16.msra.mxu1 %v642_v51  ;;  %v36_v12 = vld [vmem:[%s1194_s1 + $0x68] sm:$0xff]  ;;  %v67_v15 = vld [vmem:[%s1194_s1 + $0x160] sm:$0xff]  ;;  %v652_v18 = vpack.c.bf16 %v84_v9, %v83_v8  ;;  %v54_v20 = vld [vmem:[%s1194_s1 + $0xf8] sm:$0xff] }
  0x14   :  { %645 = vmatprep.subr.bf16.mxu1 %v644_v56  ;;  %v68_v16 = vld [vmem:[%s1194_s1 + $0x168] sm:$0xff]  ;;  %v18_v21 = vld [vmem:[%s1193_s0 + $0x18] sm:$0xff]  ;;  %v85_v22 = vld [vmem:[%s1194_s1 + $0x1f0] sm:$0xff]  ;;  %v622_v24 = vpack.c.bf16 %v36_v12, %v35_v11  ;;  %v624_v26 = vpack.c.bf16 %v54_v20, %v53_v19 }
  0x15   :  { %615 = vmatpush3.bf16.msra.mxu0 %v614_v62  ;;  %v16_v17 = vld [vmem:[%s1193_s0 + $0x8] sm:$0xff]  ;;  %v86_v23 = vld [vmem:[%s1194_s1 + $0x1f8] sm:$0xff]  ;;  %292 = vmatprep.mubr.f32.mxu1 %v18_v21  ;;  %v654_v25 = vpack.c.bf16 %v68_v16, %v67_v15  ;;  %v37_v27 = vld [vmem:[%s1194_s1 + $0x70] sm:$0xff] }
  0x16   :  { %617 = vmatprep.subr.bf16.mxu0 %v616_v0  ;;  %222 = vmatprep.mubr.f32.mxu0 %v16_v17  ;;  %v38_v28 = vld [vmem:[%s1194_s1 + $0x78] sm:$0xff]  ;;  %v69_v29 = vld [vmem:[%s1194_s1 + $0x170] sm:$0xff]  ;;  %v656_v30 = vpack.c.bf16 %v86_v23, %v85_v22  ;;  %v103_v32 = vld [vmem:[%s1194_s1 + $0x280] sm:$0xff] }
  0x17   :  { %647 = vmatpush3.bf16.msra.mxu1 %v646_v63  ;;  %v70_v31 = vld [vmem:[%s1194_s1 + $0x178] sm:$0xff]  ;;  %v104_v33 = vld [vmem:[%s1194_s1 + $0x288] sm:$0xff]  ;;  %v135_v34 = vld [vmem:[%s1194_s1 + $0x380] sm:$0xff]  ;;  %v626_v36 = vpack.c.bf16 %v38_v28, %v37_v27 }
  0x18   :  { %649 = vmatprep.subr.bf16.mxu1 %v648_v4  ;;  %v136_v35 = vld [vmem:[%s1194_s1 + $0x388] sm:$0xff]  ;;  %v658_v37 = vpack.c.bf16 %v70_v31, %v69_v29  ;;  %v660_v38 = vpack.c.bf16 %v104_v33, %v103_v32  ;;  %v87_v39 = vld [vmem:[%s1194_s1 + $0x200] sm:$0xff]  ;;  %v105_v44 = vld [vmem:[%s1194_s1 + $0x290] sm:$0xff] }
  0x19   :  { %619 = vmatpush3.bf16.msra.mxu0 %v618_v10  ;;  %v88_v40 = vld [vmem:[%s1194_s1 + $0x208] sm:$0xff]  ;;  %v119_v41 = vld [vmem:[%s1194_s1 + $0x300] sm:$0xff]  ;;  %v692_v42 = vpack.c.bf16 %v136_v35, %v135_v34  ;;  %v106_v45 = vld [vmem:[%s1194_s1 + $0x298] sm:$0xff] }
  0x1a   :  { %621 = vmatprep.subr.bf16.mxu0 %v620_v14  ;;  %v120_v43 = vld [vmem:[%s1194_s1 + $0x308] sm:$0xff]  ;;  %v137_v46 = vld [vmem:[%s1194_s1 + $0x390] sm:$0xff]  ;;  %v138_v47 = vld [vmem:[%s1194_s1 + $0x398] sm:$0xff]  ;;  %v662_v49 = vpack.c.bf16 %v88_v40, %v87_v39  ;;  %v664_v52 = vpack.c.bf16 %v106_v45, %v105_v44 }
  0x1b   :  { %651 = vmatpush3.bf16.msra.mxu1 %v650_v13  ;;  %v15_v48 = vld [vmem:[%s1193_s0] sm:$0xff]  ;;  %v17_v50 = vld [vmem:[%s1193_s0 + $0x10] sm:$0xff]  ;;  %v694_v51 = vpack.c.bf16 %v120_v43, %v119_v41  ;;  %v90_v54 = vld [vmem:[%s1194_s1 + $0x218] sm:$0xff]  ;;  %v696_v56 = vpack.c.bf16 %v138_v47, %v137_v46 }
  0x1c   :  { %653 = vmatprep.subr.bf16.mxu1 %v652_v18  ;;  %v89_v53 = vld [vmem:[%s1194_s1 + $0x210] sm:$0xff]  ;;  %v122_v57 = vld [vmem:[%s1194_s1 + $0x318] sm:$0xff]  ;;  %v107_v58 = vld [vmem:[%s1194_s1 + $0x2a0] sm:$0xff] }
  0x1d   :  { %623 = vmatpush3.bf16.msra.mxu0 %v622_v24  ;;  %v121_v55 = vld [vmem:[%s1194_s1 + $0x310] sm:$0xff]  ;;  %v108_v59 = vld [vmem:[%s1194_s1 + $0x2a8] sm:$0xff]  ;;  %v139_v60 = vld [vmem:[%s1194_s1 + $0x3a0] sm:$0xff]  ;;  %v666_v62 = vpack.c.bf16 %v90_v54, %v89_v53 }
  0x1e   :  { %625 = vmatprep.subr.bf16.mxu0 %v624_v26  ;;  %v140_v61 = vld [vmem:[%s1194_s1 + $0x3a8] sm:$0xff]  ;;  %v698_v63 = vpack.c.bf16 %v122_v57, %v121_v55  ;;  %v668_v0 = vpack.c.bf16 %v108_v59, %v107_v58  ;;  %v91_v1 = vld [vmem:[%s1194_s1 + $0x220] sm:$0xff]  ;;  %v109_v6 = vld [vmem:[%s1194_s1 + $0x2b0] sm:$0xff] }
  0x1f   :  { %655 = vmatpush3.bf16.msra.mxu1 %v654_v25  ;;  %v92_v2 = vld [vmem:[%s1194_s1 + $0x228] sm:$0xff]  ;;  %v123_v3 = vld [vmem:[%s1194_s1 + $0x320] sm:$0xff]  ;;  %v700_v4 = vpack.c.bf16 %v140_v61, %v139_v60  ;;  %v110_v7 = vld [vmem:[%s1194_s1 + $0x2b8] sm:$0xff] }
  0x20   :  { %657 = vmatprep.subr.bf16.mxu1 %v656_v30  ;;  %v124_v5 = vld [vmem:[%s1194_s1 + $0x328] sm:$0xff]  ;;  %v141_v8 = vld [vmem:[%s1194_s1 + $0x3b0] sm:$0xff]  ;;  %v142_v9 = vld [vmem:[%s1194_s1 + $0x3b8] sm:$0xff]  ;;  %v670_v10 = vpack.c.bf16 %v92_v2, %v91_v1  ;;  %v672_v12 = vpack.c.bf16 %v110_v7, %v109_v6 }
  0x21   :  { %627 = vmatpush3.bf16.msra.mxu0 %v626_v36  ;;  %v702_v11 = vpack.c.bf16 %v124_v5, %v123_v3  ;;  %v93_v13 = vld [vmem:[%s1194_s1 + $0x230] sm:$0xff]  ;;  %v94_v14 = vld [vmem:[%s1194_s1 + $0x238] sm:$0xff]  ;;  %v704_v16 = vpack.c.bf16 %v142_v9, %v141_v8  ;;  %v111_v18 = vld [vmem:[%s1194_s1 + $0x2c0] sm:$0xff] }
  0x22   :  { %661 = vmatprep.subr.bf16.mxu0 %v660_v38  ;;  %v125_v15 = vld [vmem:[%s1194_s1 + $0x330] sm:$0xff]  ;;  %v126_v17 = vld [vmem:[%s1194_s1 + $0x338] sm:$0xff]  ;;  %v112_v19 = vld [vmem:[%s1194_s1 + $0x2c8] sm:$0xff]  ;;  %v674_v22 = vpack.c.bf16 %v94_v14, %v93_v13 }
  0x23   :  { %659 = vmatpush3.bf16.msra.mxu1 %v658_v37  ;;  %v143_v20 = vld [vmem:[%s1194_s1 + $0x3c0] sm:$0xff]  ;;  %v144_v21 = vld [vmem:[%s1194_s1 + $0x3c8] sm:$0xff]  ;;  %v22_v25 = vld [vmem:[%s1193_s0 + $0x38] sm:$0xff]  ;;  %v706_v26 = vpack.c.bf16 %v126_v17, %v125_v15  ;;  %v676_v27 = vpack.c.bf16 %v112_v19, %v111_v18 }
  0x24   :  { %693 = vmatprep.subr.bf16.mxu1 %v692_v42  ;;  %223 = vmatmul.mubr.f32.vlgmr.msra.gmra.mrb[0].mxu0 %v15_v48  ;;  %v95_v23 = vld [vmem:[%s1194_s1 + $0x240] sm:$0xff]  ;;  %v20_v24 = vld [vmem:[%s1193_s0 + $0x28] sm:$0xff] }
  0x25   :  { %663 = vmatpush3.bf16.msra.mxu0 %v662_v49  ;;  %v96_v28 = vld [vmem:[%s1194_s1 + $0x248] sm:$0xff]  ;;  %v127_v29 = vld [vmem:[%s1194_s1 + $0x340] sm:$0xff] }
  0x26   :  { %293 = vmatmul.mubr.f32.vlgmr.msra.gmra.mrb[0].mxu1 %v17_v50  ;;  %665 = vmatprep.subr.bf16.mxu0 %v664_v52 }
  0x27   :  { %695 = vmatpush3.bf16.msra.mxu1 %v694_v51 }
  0x28   :  { %697 = vmatprep.subr.bf16.mxu1 %v696_v56 }
  0x29   :  { %667 = vmatpush3.bf16.msra.mxu0 %v666_v62 }
  0x2a   :  { %669 = vmatprep.subr.bf16.mxu0 %v668_v0 }
  0x2b   :  { %699 = vmatpush3.bf16.msra.mxu1 %v698_v63 }
  0x2c   :  { %701 = vmatprep.subr.bf16.mxu1 %v700_v4 }
  0x2d   :  { %671 = vmatpush3.bf16.msra.mxu0 %v670_v10 }
  0x2e   :  { %673 = vmatprep.subr.bf16.mxu0 %v672_v12 }
  0x2f   :  { %703 = vmatpush3.bf16.msra.mxu1 %v702_v11 }
  0x30   :  { %8 = vsyncpa [#allocation3], 0  ;;  %705 = vmatprep.subr.bf16.mxu1 %v704_v16  ;;  %v708_v30 = vpack.c.bf16 %v144_v21, %v143_v20  ;;  %v128_v31 = vld [vmem:[%s1194_s1 + $0x348] sm:$0xff]  ;;  %v113_v32 = vld [vmem:[%s1194_s1 + $0x2d0] sm:$0xff]  ;;  %362 = vmatprep.mubr.f32.mxu0 %v20_v24  ;;  %v678_v36 = vpack.c.bf16 %v96_v28, %v95_v23  ;;  %vm439_vm0 = vcmask 523264  }
  0x31   :  { %v114_v33 = vld [vmem:[%s1194_s1 + $0x2d8] sm:$0xff]  ;;  %v145_v34 = vld [vmem:[%s1194_s1 + $0x3d0] sm:$0xff]  ;;  %432 = vmatprep.mubr.f32.mxu1 %v22_v25  ;;  %675 = vmatpush3.bf16.msra.mxu0 %v674_v22  ;;  %v710_v37 = vpack.c.bf16 %v128_v31, %v127_v29  ;;  %v115_v44 = vld [vmem:[%s1194_s1 + $0x2e0] sm:$0xff] }
  0x32   :  { %v146_v35 = vld [vmem:[%s1194_s1 + $0x3d8] sm:$0xff]  ;;  %677 = vmatprep.subr.bf16.mxu0 %v676_v27  ;;  %v680_v38 = vpack.c.bf16 %v114_v33, %v113_v32  ;;  %v97_v39 = vld [vmem:[%s1194_s1 + $0x250] sm:$0xff]  ;;  %v116_v45 = vld [vmem:[%s1194_s1 + $0x2e8] sm:$0xff] }
  0x33   :  { %707 = vmatpush3.bf16.msra.mxu1 %v706_v26  ;;  %v98_v40 = vld [vmem:[%s1194_s1 + $0x258] sm:$0xff]  ;;  %v129_v41 = vld [vmem:[%s1194_s1 + $0x350] sm:$0xff]  ;;  %v712_v42 = vpack.c.bf16 %v146_v35, %v145_v34  ;;  %v147_v46 = vld [vmem:[%s1194_s1 + $0x3e0] sm:$0xff]  ;;  %v684_v50 = vpack.c.bf16 %v116_v45, %v115_v44 }
  0x34   :  { %709 = vmatprep.subr.bf16.mxu1 %v708_v30  ;;  %v130_v43 = vld [vmem:[%s1194_s1 + $0x358] sm:$0xff]  ;;  %v148_v47 = vld [vmem:[%s1194_s1 + $0x3e8] sm:$0xff]  ;;  %v682_v48 = vpack.c.bf16 %v98_v40, %v97_v39  ;;  %v99_v51 = vld [vmem:[%s1194_s1 + $0x260] sm:$0xff] }
  0x35   :  { %679 = vmatpush3.bf16.msra.mxu0 %v678_v36  ;;  %v714_v49 = vpack.c.bf16 %v130_v43, %v129_v41  ;;  %v100_v52 = vld [vmem:[%s1194_s1 + $0x268] sm:$0xff]  ;;  %v131_v53 = vld [vmem:[%s1194_s1 + $0x360] sm:$0xff]  ;;  %v716_v54 = vpack.c.bf16 %v148_v47, %v147_v46  ;;  %v117_v56 = vld [vmem:[%s1194_s1 + $0x2f0] sm:$0xff] }
  0x36   :  { %681 = vmatprep.subr.bf16.mxu0 %v680_v38  ;;  %v132_v55 = vld [vmem:[%s1194_s1 + $0x368] sm:$0xff]  ;;  %v118_v57 = vld [vmem:[%s1194_s1 + $0x2f8] sm:$0xff]  ;;  %v149_v58 = vld [vmem:[%s1194_s1 + $0x3f0] sm:$0xff]  ;;  %v686_v60 = vpack.c.bf16 %v100_v52, %v99_v51 }
  0x37   :  { %711 = vmatpush3.bf16.msra.mxu1 %v710_v37  ;;  %v150_v59 = vld [vmem:[%s1194_s1 + $0x3f8] sm:$0xff]  ;;  %v718_v61 = vpack.c.bf16 %v132_v55, %v131_v53  ;;  %v688_v62 = vpack.c.bf16 %v118_v57, %v117_v56  ;;  %v101_v63 = vld [vmem:[%s1194_s1 + $0x270] sm:$0xff]  ;;  %v19_v6 = vld [vmem:[%s1193_s0 + $0x20] sm:$0xff] }
  0x38   :  { %713 = vmatprep.subr.bf16.mxu1 %v712_v42  ;;  %v102_v0 = vld [vmem:[%s1194_s1 + $0x278] sm:$0xff]  ;;  %v720_v1 = vpack.c.bf16 %v150_v59, %v149_v58  ;;  %v133_v2 = vld [vmem:[%s1194_s1 + $0x370] sm:$0xff]  ;;  %v455_v9 = vld [vmem:[%s1195_s2] ss:$0 sm:$0xff] }
  0x39   :  { %683 = vmatpush3.bf16.msra.mxu0 %v682_v48  ;;  %v134_v3 = vld [vmem:[%s1194_s1 + $0x378] sm:$0xff]  ;;  %v690_v4 = vpack.c.bf16 %v102_v0, %v101_v63  ;;  %v21_v7 = vld [vmem:[%s1193_s0 + $0x30] sm:$0xff]  ;;  %s749_s0 = smov [#allocation2]  }
  0x3a   :  { %685 = vmatprep.subr.bf16.mxu0 %v684_v50  ;;  %v722_v5 = vpack.c.bf16 %v134_v3, %v133_v2  ;;  %s447_s15 = sshll.u32 %s749_s0, 4  ;;  %s448_s15 = int_to_ptr.vmem [resolvable:$true] %s447_s15 }
  0x3b   :  { %715 = vmatpush3.bf16.msra.mxu1 %v714_v49  ;;  %s725_s2 = scalar_lea.vmem %s448_s15, 128  ;;  %p730_p1 = scmp.lt.s32.totalorder %s448_s15, %s448_s15 }
  0x3c   :  { %717 = vmatprep.subr.bf16.mxu1 %v716_v54  ;;  %p726_p0 = scmp.ne.s32.totalorder %s448_s15, %s725_s2  ;;  %p731_p2 = scmp.lt.s32.totalorder %s725_s2, %s725_s2 }
  0x3d   :  { %687 = vmatpush3.bf16.msra.mxu0 %v686_v60 }
  0x3e   :  { %689 = vmatprep.subr.bf16.mxu0 %v688_v62  ;;  %p732_p3 = por %p731_p2, %p730_p1 }
  0x3f   :  { %719 = vmatpush3.bf16.msra.mxu1 %v718_v61 }
  0x40   :  { %721 = vmatprep.subr.bf16.mxu1 %v720_v1  ;;  %p733_p4 = pnand %p732_p3, %p726_p0 }
  0x41   :  { %691 = vmatpush3.bf16.msra.mxu0 %v690_v4 }
  0x43   :  { %723 = vmatpush3.bf16.msra.mxu1 %v722_v5 }
  0x44   :  { %363 = vmatmul.mubr.f32.vlgmr.msra.gmra.mrb[2].mxu0 %v19_v6 }
  0x46   :  { %433 = vmatmul.mubr.f32.vlgmr.msra.gmra.mrb[2].mxu1 %v21_v7 }
  0xf7   :  { %v488_v8 = vpop.f32.mrb[0].mxu0 }
  0xf8   :  { %v489_v10 = vpop.f32.mrb[1].mxu0 }
  0xf9   :  { %v523_v11 = vpop.f32.mrb[0].mxu1  ;;  %v490_v12 = vadd.f32 %v489_v10, %v488_v8 }
  0xfa   :  { %v524_v13 = vpop.f32.mrb[1].mxu1 }
  0xfb   :  { %v525_v14 = vadd.f32 %v524_v13, %v523_v11  ;;  %v225_v15 = vadd.f32 %v490_v12, %v455_v9 }
  0xfd   :  { %v295_v16 = vadd.f32 %v525_v14, %v225_v15 }
 0x117   :  { %v558_v17 = vpop.f32.mrb[2].mxu0 }
 0x118   :  { %v559_v18 = vpop.f32.mrb[3].mxu0 }
 0x119   :  { %v593_v19 = vpop.f32.mrb[2].mxu1  ;;  %v560_v20 = vadd.f32 %v559_v18, %v558_v17 }
 0x11a   :  { %v594_v21 = vpop.f32.mrb[3].mxu1 }
 0x11b   :  { %v595_v22 = vadd.f32 %v594_v21, %v593_v19  ;;  %v365_v23 = vadd.f32 %v560_v20, %v295_v16 }
 0x11d   :  { %v435_v24 = vadd.f32 %v595_v22, %v365_v23 }
 0x11f   :  { %v438_v25 = vmax.f32 %v435_v24, 0.0 }
 0x121   :  { %440 = vst.msk [vmem:[#allocation2] sm:$0xff] %vm439_vm0, %v438_v25 }
 0x122   :  { %736 = shalt.err (!%p733_p4)
}
 0x123   :  { %s737_s18 = scalar_lea.hbm %s1196_s3, 128 }
 0x124   :  { %p738_p5 = scmp.ne.s32.totalorder %s1196_s3, %s737_s18  ;;  %p741_p6 = scmp.lt.u32.totalorder %s737_s18, %s1196_s3 }
 0x126   :  { %p743_p7 = pnand %p741_p6, %p738_p5 }
 0x128   :  { %746 = shalt.err (!%p743_p7)
}
 0x129   :  { %450 = dma.vmem_to_hbm [thread:$0]  %s448_s15, 128, %s1196_s3, [#allocation3]  }
 0x12a   :  { %747 = dma.done.wait [#allocation3], 128  }
 0x12b   :  { %748 = vsyncadd [#allocation3], 4294967168 }
 0x12c   :  { %454 = vsyncpa [#allocation3], 1 }

</bundles_post_ra>
